<compile_context>
chip_gen: v6e
topology: v6e:2x2x1
jax: 0.10.0
libtpu: 0.0.40
codegen_flags: <defaults>
</compile_context>

<pallas_src>
import jax
import jax.numpy as jnp
from jax.experimental import pallas as pl
from jax.experimental.pallas import tpu as pltpu


def _patch_expand_kernel(x_ref, gamma_ref, beta_ref, w_ref, o_ref):
    # x_ref:     (tm, C)       token block (native dtype, upcast here)
    # gamma_ref: (1, C)  f32   LayerNorm weight
    # beta_ref:  (1, C)  f32   LayerNorm bias
    # w_ref:     (C, 2C) bf16  expand weight (transposed vs. PyTorch storage)
    # o_ref:     (r, 2, W, C)  fused pixel-shuffle output block (bf16)
    r, _, W, C = o_ref.shape

    x = x_ref[...].astype(jnp.float32)                       # (tm, C)

    # One-pass LayerNorm stats: two back-to-back lane reductions (XLU),
    # var = E[x^2] - E[x]^2 (biased, matches torch.nn.LayerNorm).
    mean = jnp.mean(x, axis=-1, keepdims=True)
    mean_sq = jnp.mean(x * x, axis=-1, keepdims=True)
    var = jnp.maximum(mean_sq - mean * mean, 0.0)
    inv = jax.lax.rsqrt(var + 1e-5)
    xn = (x - mean) * inv * gamma_ref[...] + beta_ref[...]

    # bf16 matmul on the MXU with f32 accumulation.
    y = jnp.dot(xn.astype(jnp.bfloat16), w_ref[...],
                preferred_element_type=jnp.float32)           # (tm, 2C) f32
    y = y.astype(o_ref.dtype)

    # Fused pixel-shuffle: for token (h, w), channel groups (i*2+j)*(C//2) of the
    # expanded output land at spatial (2h+i, 2w+j).  Channels [i*C, (i+1)*C) are
    # exactly the j=0 and j=1 groups back-to-back, so they form the contiguous
    # (w, c) slab of output row-parity i.  (B*H, 2, W, C) row-major is therefore
    # identical to (B, 2H, 2W, C//2) row-major.
    o_ref[:, 0:1, :, :] = y[:, :C].reshape(r, 1, W, C)
    o_ref[:, 1:2, :, :] = y[:, C:].reshape(r, 1, W, C)
    # TODO(synk): when C is not a multiple of 128 the output lane width is
    # partially masked; a lane-dense (B*H*2, W*C) output view is a possible
    # further lever but needs an in-kernel sublane->lane relayout (unvalidated).


def _pick_rows_per_block(bh, w, c, in_itemsize, out_itemsize,
                         max_block_tokens=4096):
    """Whole image rows per grid step (one block = r*W tokens).

    Picks the largest divisor of B*H whose double-buffered input/output streams,
    live f32/bf16 intermediates, and double-buffered weight fit a ~26 MiB VMEM
    budget (conservative for v7x's 64 MiB physical VMEM and v5e scoped
    defaults), capped at `max_block_tokens`.  Prefers sublane-aligned token
    counts and >= 2 grid steps (megacore); falls back to a single full-array
    block, which is always a legal block shape.
    """
    weight_bytes = 2 * (c * 2 * c) * 2                         # dbl-buffered bf16 W
    stream_per_tok = 2 * c * in_itemsize + 2 * (2 * c) * out_itemsize
    live_per_tok = c * 4 + c * 2 + (2 * c) * 4 + (2 * c) * out_itemsize
    per_tok = stream_per_tok + live_per_tok

    budget = 26 * 1024 * 1024 - weight_bytes
    budget_tokens = max(budget // per_tok, w)
    cap = min(max_block_tokens, budget_tokens)

    divisors = [d for d in range(1, bh + 1) if bh % d == 0]
    ok = [d for d in divisors if d * w <= cap and (d * w) % 8 == 0]
    multi = [d for d in ok if bh // d >= 2]
    if multi:
        return max(multi)
    if ok:
        return max(ok)
    return bh  # full-array block: block_shape == array shape is always legal


def patch_expand(x, gamma, beta, w_expand, input_resolution, *,
                 out_dtype=jnp.bfloat16, max_block_tokens=4096):
    """x: (B, H*W, C) -> (B, 4*H*W, C//2)."""
    H, W = input_resolution
    B, L, C = x.shape
    assert L == H * W, f"expected L == H*W ({H * W}), got {L}"
    assert C % 2 == 0

    out_itemsize = jnp.dtype(out_dtype).itemsize
    BH = B * H
    r = _pick_rows_per_block(BH, W, C, x.dtype.itemsize, out_itemsize,
                             max_block_tokens)
    tm = r * W
    grid = (BH // r,)

    # No wrapper dtype cast of the activation stream: keep native dtype.
    x2 = x.reshape(BH * W, C)
    w_bf16 = w_expand.astype(jnp.bfloat16)          # bf16 MXU, halves weight DMA
    gamma2 = gamma.reshape(1, C).astype(jnp.float32)
    beta2 = beta.reshape(1, C).astype(jnp.float32)

    flops = 2 * (BH * W) * C * (2 * C)
    bytes_accessed = (x2.size * x2.dtype.itemsize
                      + w_bf16.size * 2
                      + gamma2.size * 4 + beta2.size * 4
                      + BH * 2 * W * C * out_itemsize)

    out = pl.pallas_call(
        _patch_expand_kernel,
        out_shape=jax.ShapeDtypeStruct((BH, 2, W, C), out_dtype),
        grid_spec=pltpu.PrefetchScalarGridSpec(
            num_scalar_prefetch=0,
            grid=grid,
            in_specs=[
                pl.BlockSpec((tm, C), lambda i: (i, 0)),
                # Constant blocks (same block index every step -> fetched once
                # by the pipeline; only their second buffer is idle VMEM, which
                # the budget above accounts for).
                pl.BlockSpec((1, C), lambda i: (0, 0)),
                pl.BlockSpec((1, C), lambda i: (0, 0)),
                pl.BlockSpec((C, 2 * C), lambda i: (0, 0)),
            ],
            out_specs=pl.BlockSpec((r, 2, W, C), lambda i: (i, 0, 0, 0)),
        ),
        compiler_params=pltpu.CompilerParams(
            dimension_semantics=("parallel",),
            vmem_limit_bytes=48 * 1024 * 1024,
        ),
        cost_estimate=pl.CostEstimate(
            flops=flops, transcendentals=BH * W, bytes_accessed=bytes_accessed),
    )(x2, gamma2, beta2, w_bf16)

    # (B*H, 2, W, C) row-major is exactly the pixel-shuffled (B, 2H, 2W, C//2)
    # layout, so this is a free metadata reshape (no transpose, no HBM pass).
    return out.reshape(B, 4 * L, C // 2)


def patch_expand_reference(x, gamma, beta, w_expand, input_resolution):
    """Pure-JAX f32 reference matching the PyTorch forward."""
    H, W = input_resolution
    B, L, C = x.shape
    mean = jnp.mean(x, axis=-1, keepdims=True)
    var = jnp.mean((x - mean) ** 2, axis=-1, keepdims=True)
    xn = (x - mean) / jnp.sqrt(var + 1e-5) * gamma + beta
    xe = xn @ w_expand                                   # (B, L, 2C)
    xe = xe.reshape(B, H, W, 2, 2, C // 2)
    xe = jnp.transpose(xe, (0, 1, 3, 2, 4, 5))
    return xe.reshape(B, 4 * L, C // 2)


if __name__ == "__main__":
    # Small but TPU-friendly shapes: B=2, H=W=8 (L=64), dim=C=64.
    B, H, W, C = 2, 8, 8, 64
    L = H * W

    key = jax.random.PRNGKey(0)
    kx, kw = jax.random.split(key)
    x = jax.random.normal(kx, (B, L, C), dtype=jnp.float32)

    # Deterministic parameter init (shapes from the module's __init__):
    #   norm   : LayerNorm(dim)                 -> gamma=ones(C), beta=zeros(C)
    #   expand : Linear(dim, 2*dim, bias=False) -> weight stored transposed (C, 2C)
    gamma = jnp.ones((C,), dtype=jnp.float32)
    beta = jnp.zeros((C,), dtype=jnp.float32)
    w_expand = jax.random.normal(kw, (C, 2 * C), dtype=jnp.float32) * 0.02
    # TODO(synk): self.reduce (Linear(2*dim, dim//2)) is defined in __init__ but
    # never used in the PyTorch forward, so it is intentionally not implemented.

    y = jax.block_until_ready(patch_expand(x, gamma, beta, w_expand, (H, W)))
    y_ref = patch_expand_reference(x, gamma, beta, w_expand, (H, W))

    assert y.shape == (B, 4 * L, C // 2), y.shape
    assert y.dtype == jnp.bfloat16, y.dtype
    # bf16 matmul + bf16 output => loosened tolerance vs f32 reference.
    assert jnp.allclose(y.astype(jnp.float32), y_ref, atol=2e-2, rtol=2e-2), \
        "mismatch vs reference"

    print("KERNEL_OK")
</pallas_src>

<mosaic_0001>
module attributes {stable_mosaic.version = 11 : i64} {
  func.func @_patch_expand_kernel(%arg0: i32, %arg1: memref<64x64xf32, #tpu.memory_space<vmem>>, %arg2: memref<1x64xf32, #tpu.memory_space<vmem>>, %arg3: memref<1x64xf32, #tpu.memory_space<vmem>>, %arg4: memref<64x128xbf16, #tpu.memory_space<vmem>>, %arg5: memref<8x2x8x64xbf16, #tpu.memory_space<vmem>>) attributes {dimension_semantics = [#tpu.dimension_semantics<parallel>], iteration_bounds = array<i64: 2>, scalar_prefetch = 0 : i64, scratch_operands = 0 : i64, tpu.core_type = #tpu.core_type<tc>, window_params = [{transform_indices = @transform_0, window_bounds = array<i64: 64, 64>}, {pipeline_mode = #tpu.pipeline_mode<synchronous>, transform_indices = @transform_1, window_bounds = array<i64: 1, 64>}, {pipeline_mode = #tpu.pipeline_mode<synchronous>, transform_indices = @transform_2, window_bounds = array<i64: 1, 64>}, {pipeline_mode = #tpu.pipeline_mode<synchronous>, transform_indices = @transform_3, window_bounds = array<i64: 64, 128>}, {transform_indices = @transform_4, window_bounds = array<i64: 8, 2, 8, 64>}]} {
    %c0 = arith.constant 0 : index
    %c0_0 = arith.constant 0 : index
    %0 = vector.load %arg1[%c0, %c0_0] : memref<64x64xf32, #tpu.memory_space<vmem>>, vector<64x64xf32>
    %cst = arith.constant dense<0.000000e+00> : vector<64xf32>
    %1 = vector.multi_reduction <add>, %0, %cst [1] : vector<64x64xf32> to vector<64xf32>
    %2 = vector.shape_cast %1 : vector<64xf32> to vector<64x1xf32>
    %cst_1 = arith.constant 6.400000e+01 : f32
    %3 = vector.broadcast %cst_1 : f32 to vector<64x1xf32>
    %4 = arith.divf %2, %3 : vector<64x1xf32>
    %5 = arith.mulf %0, %0 : vector<64x64xf32>
    %cst_2 = arith.constant dense<0.000000e+00> : vector<64xf32>
    %6 = vector.multi_reduction <add>, %5, %cst_2 [1] : vector<64x64xf32> to vector<64xf32>
    %7 = vector.shape_cast %6 : vector<64xf32> to vector<64x1xf32>
    %cst_3 = arith.constant 6.400000e+01 : f32
    %8 = vector.broadcast %cst_3 : f32 to vector<64x1xf32>
    %9 = arith.divf %7, %8 : vector<64x1xf32>
    %10 = arith.mulf %4, %4 : vector<64x1xf32>
    %11 = arith.subf %9, %10 : vector<64x1xf32>
    %cst_4 = arith.constant 0.000000e+00 : f32
    %12 = vector.broadcast %cst_4 : f32 to vector<64x1xf32>
    %13 = arith.maximumf %11, %12 : vector<64x1xf32>
    %cst_5 = arith.constant 9.99999974E-6 : f32
    %14 = vector.broadcast %cst_5 : f32 to vector<64x1xf32>
    %15 = arith.addf %13, %14 : vector<64x1xf32>
    %16 = math.rsqrt %15 : vector<64x1xf32>
    %17 = vector.broadcast %4 : vector<64x1xf32> to vector<64x64xf32>
    %18 = arith.subf %0, %17 : vector<64x64xf32>
    %19 = vector.broadcast %16 : vector<64x1xf32> to vector<64x64xf32>
    %20 = arith.mulf %18, %19 : vector<64x64xf32>
    %c0_6 = arith.constant 0 : index
    %c0_7 = arith.constant 0 : index
    %21 = vector.load %arg2[%c0_6, %c0_7] : memref<1x64xf32, #tpu.memory_space<vmem>>, vector<1x64xf32>
    %22 = vector.broadcast %21 : vector<1x64xf32> to vector<64x64xf32>
    %23 = arith.mulf %20, %22 : vector<64x64xf32>
    %c0_8 = arith.constant 0 : index
    %c0_9 = arith.constant 0 : index
    %24 = vector.load %arg3[%c0_8, %c0_9] : memref<1x64xf32, #tpu.memory_space<vmem>>, vector<1x64xf32>
    %25 = vector.broadcast %24 : vector<1x64xf32> to vector<64x64xf32>
    %26 = arith.addf %23, %25 : vector<64x64xf32>
    %27 = arith.truncf %26 : vector<64x64xf32> to vector<64x64xbf16>
    %c0_10 = arith.constant 0 : index
    %c0_11 = arith.constant 0 : index
    %28 = vector.load %arg4[%c0_10, %c0_11] : memref<64x128xbf16, #tpu.memory_space<vmem>>, vector<64x128xbf16>
    %cst_12 = arith.constant dense<0.000000e+00> : vector<64x128xf32>
    %29 = tpu.matmul %27, %28, %cst_12 {dimension_numbers = #tpu.dot_dimension_numbers<[1], [0], [0], [1], [0, 0, 1, 1], [], []>} : vector<64x64xbf16>, vector<64x128xbf16>, vector<64x128xf32> -> vector<64x128xf32>
    %30 = arith.truncf %29 : vector<64x128xf32> to vector<64x128xbf16>
    %31 = vector.extract_strided_slice %30 {offsets = [0, 0], sizes = [64, 64], strides = [1, 1]} : vector<64x128xbf16> to vector<64x64xbf16>
    %32 = vector.shape_cast %31 : vector<64x64xbf16> to vector<8x1x8x64xbf16>
    %c0_13 = arith.constant 0 : index
    %c0_14 = arith.constant 0 : index
    %c0_15 = arith.constant 0 : index
    %c0_16 = arith.constant 0 : index
    %33 = vector.load %arg5[%c0_13, %c0_14, %c0_15, %c0_16] : memref<8x2x8x64xbf16, #tpu.memory_space<vmem>>, vector<8x1x8x64xbf16>
    tpu.vector_store %arg5[%c0_13, %c0_14, %c0_15, %c0_16], %32 {strides = array<i32>} : memref<8x2x8x64xbf16, #tpu.memory_space<vmem>>, vector<8x1x8x64xbf16>,
    %34 = vector.extract_strided_slice %30 {offsets = [0, 64], sizes = [64, 64], strides = [1, 1]} : vector<64x128xbf16> to vector<64x64xbf16>
    %35 = vector.shape_cast %34 : vector<64x64xbf16> to vector<8x1x8x64xbf16>
    %c0_17 = arith.constant 0 : index
    %c1 = arith.constant 1 : index
    %c0_18 = arith.constant 0 : index
    %c0_19 = arith.constant 0 : index
    %36 = vector.load %arg5[%c0_17, %c1, %c0_18, %c0_19] : memref<8x2x8x64xbf16, #tpu.memory_space<vmem>>, vector<8x1x8x64xbf16>
    tpu.vector_store %arg5[%c0_17, %c1, %c0_18, %c0_19], %35 {strides = array<i32>} : memref<8x2x8x64xbf16, #tpu.memory_space<vmem>>, vector<8x1x8x64xbf16>,
    return
  }
  func.func @transform_0(%arg0: i32) -> (i32, i32) {
    %c0_i32 = arith.constant 0 : i32
    %c0_i32_0 = arith.constant 0 : i32
    return %arg0, %c0_i32 : i32, i32
  }
  func.func @transform_1(%arg0: i32) -> (i32, i32) {
    %c0_i32 = arith.constant 0 : i32
    %c0_i32_0 = arith.constant 0 : i32
    %c0_i32_1 = arith.constant 0 : i32
    return %c0_i32, %c0_i32_0 : i32, i32
  }
  func.func @transform_2(%arg0: i32) -> (i32, i32) {
    %c0_i32 = arith.constant 0 : i32
    %c0_i32_0 = arith.constant 0 : i32
    %c0_i32_1 = arith.constant 0 : i32
    return %c0_i32, %c0_i32_0 : i32, i32
  }
  func.func @transform_3(%arg0: i32) -> (i32, i32) {
    %c0_i32 = arith.constant 0 : i32
    %c0_i32_0 = arith.constant 0 : i32
    %c0_i32_1 = arith.constant 0 : i32
    return %c0_i32, %c0_i32_0 : i32, i32
  }
  func.func @transform_4(%arg0: i32) -> (i32, i32, i32, i32) {
    %c0_i32 = arith.constant 0 : i32
    %c0_i32_0 = arith.constant 0 : i32
    %c0_i32_1 = arith.constant 0 : i32
    %c0_i32_2 = arith.constant 0 : i32
    return %arg0, %c0_i32, %c0_i32_0, %c0_i32_1 : i32, i32, i32, i32
  }
}

</mosaic_0001>

<bundles_post_ra>
// kernel: tpu_custom_call.1
= control target key start
LH: loop header
LB: loop body
LE: loop exit
PB: predicated region body
PF: predicated region fallthrough
CT: control target
= control target key end

     0   :  { %9 = vsyncpa [#allocation3], 0  ;;  %s1140_s0 = inlined_call_operand.vmem [shape: f32[128,64], index: 0, kind: input, shape index: {}]   ;;  %s1141_s1 = inlined_call_operand.vmem [shape: f32[1,64], index: 1, kind: input, shape index: {}]   ;;  %s1142_s2 = inlined_call_operand.vmem [shape: f32[1,64], index: 2, kind: input, shape index: {}]   ;;  %s1143_s3 = inlined_call_operand.vmem [shape: bf16[64,128], index: 3, kind: input, shape index: {}]   ;;  %s1144_s4 = inlined_call_operand.hbm [shape: bf16[16,2,8,64], index: 4, kind: output, shape index: {}]  }
   0x1   :  { %11 = vsyncpa [#allocation3 + $0x1], 0  ;;  %s864_s15 = smov 0   ;;  %s866_s16 = smov 0  }
   0x2   :  { %s868_s17 = smov 0   ;;  %s870_s18 = smov 0  }
   0x3 LB: > { %s885_s19 = sadd.s32 4294967295, %s834_s18   ;;  %s632_s20 = sadd.s32 4294967294, %s834_s18   ;;  %s834_s18 = sphi %s870_s18, %s1150_s18   ;;  %s830_s17 = sphi %s868_s17, %s1149_s17   ;;  %s826_s16 = sphi %s866_s16, %s1148_s16   ;;  %s822_s15 = sphi %s864_s15, %s1147_s15  }
   0x4   : > { %s889_s21 = sadd.s32 1, %s834_s18   ;;  %s113_s22 = sadd.s32 1, %s830_s17 }
   0x5   : > { %s110_s23 = ssub.s32 %s834_s18, %s889_s21  ;;  %p123_p0 = scmp.ne.s32.totalorder %s830_s17, %s826_s16 }
   0x6   : > { %p111_p1 = scmp.eq.s32.totalorder %s110_s23, 0  ;;  %p124_p2 = scmp.eq.s32.totalorder %s885_s19, 1 }
   0x7   : > { %p129_p3 = scmp.ne.s32.totalorder %s826_s16, %s822_s15  ;;  %p130_p4 = scmp.eq.s32.totalorder %s632_s20, 1 }
   0x8   : > { %s900_s24 = scalar_select %p111_p1, %s830_s17, %s113_s22  }
   0x9   : > { %p902_p5 = por %p124_p2, %p123_p0  ;;  %p906_p6 = por %p130_p4, %p129_p3 }
   0xa   : > { %p635_p7 = scmp.ge.s32.totalorder %s834_s18, 1  ;;  %p166_p8 = scmp.lt.s32.totalorder %s834_s18, 3 }
   0xc   : > { %p167_p9 = pnand %p635_p7, %p166_p8 }
   0xd   : > { %s637_s27 = sshll.u32 (!%p167_p9), %s885_s19, 3  ;;  %s836_s30 = smov (!%p167_p9), 64  }
   0xe   : > { %170 = sbr.rel (%p167_p9) target bundleno = 557 (0x22d), region = 36  ;;  %p193_p10 = scmp.lt.s32.totalorder (!%p167_p9), %s637_s27, 15 }
   0xf   : > { %s837_s11 = smov (!%p167_p9), [#allocation2]  }
  0x10   : > { %s778_s12 = sshll.u32 (!%p167_p9), %s837_s11, 4  ;;  %s779_s12 = int_to_ptr.vmem [resolvable:$false] %s778_s12 }
  0x11   : > { %s780_s13 = scalar_lea.vmem (!%p167_p9), %s779_s12, 2048 }
  0x13   : > { %s1152_s27 = smov (!%p193_p10, %s637_s27), 15  ;;  %vm208_vm0 = vcmask 523264   ;;  %v754_v32 = vld [vmem:[%s1143_s3 + $0x18] sm:$0xff]   ;;  %v755_v33 = vld [vmem:[%s1143_s3 + $0x10] sm:$0xff]   ;;  %v756_v34 = vld [vmem:[%s1143_s3 + $0x8] sm:$0xff]   ;;  %vm513_vm1 = vcmask 519168  }
  0x14   : > { %s638_s28 = sshll.u32 %s1152_s27, 3  ;;  %689 = vmatprep.subr.bf16.mxu0 %v754_v32  ;;  %705 = vmatprep.subr.bf16.mxu1 %v754_v32  ;;  %v757_v35 = vld [vmem:[%s1143_s3] sm:$0xff]   ;;  %s189_s27 = sand.u32 1, %s826_s16  }
  0x15   : > { %s196_s5 = scalar_lea.vmem %s1140_s0, %s638_s28  ;;  %690 = vmatpush3.bf16.msra.mxu0 %v754_v32  ;;  %709 = vmatpush3.bf16.msra.mxu1 %v754_v32  ;;  %s636_s28 = sshll.u32 %s189_s27, 6 }
  0x16   : > { %v916_v0 = vld [vmem:[%s196_s5 + $0x20] sm:$0xff]  ;;  %v920_v2 = vld [vmem:[%s196_s5 + $0x28] sm:$0xff]  ;;  %v932_v8 = vld [vmem:[%s196_s5 + $0x18] sm:$0xff]  ;;  %691 = vmatprep.subr.bf16.mxu0 %v755_v33  ;;  %706 = vmatprep.subr.bf16.mxu1 %v755_v33  ;;  %s1045_s29 = scalar_lea.vmem [#allocation2], %s636_s28  ;;  %s1098_s10 = scalar_lea.sflag [#allocation3], %s189_s27 }
  0x17   : > { %v918_v1 = vld [vmem:[%s196_s5] sm:$0xff]  ;;  %v221_v3 = vsel %vm208_vm0, %v916_v0, 0.0  ;;  %v926_v5 = vld [vmem:[%s196_s5 + $0x8] sm:$0xff]  ;;  %v224_v6 = vsel %vm208_vm0, %v920_v2, 0.0  ;;  %v934_v9 = vld [vmem:[%s196_s5 + $0x10] sm:$0xff]  ;;  %v218_v10 = vsel %vm208_vm0, %v932_v8, 0.0  ;;  %v247_v20 = vmul.f32 %v920_v2, %v920_v2 }
  0x18   : > { %v209_v4 = vsel %vm208_vm0, %v918_v1, 0.0  ;;  %222 = vadd.xlane.f32.xlu1 %v221_v3  ;;  %v212_v7 = vsel %vm208_vm0, %v926_v5, 0.0  ;;  %v215_v11 = vsel %vm208_vm0, %v934_v9, 0.0  ;;  %v940_v12 = vld [vmem:[%s196_s5 + $0x38] sm:$0xff]  ;;  %v942_v13 = vld [vmem:[%s196_s5 + $0x30] sm:$0xff]  ;;  %v243_v16 = vmul.f32 %v926_v5, %v926_v5  ;;  %s680_s5 = sshll.u32 %s885_s19, 10 }
  0x19   : > { %210 = vadd.xlane.f32.xlu0 %v209_v4  ;;  %v230_v14 = vsel %vm208_vm0, %v940_v12, 0.0  ;;  %v227_v15 = vsel %vm208_vm0, %v942_v13, 0.0  ;;  %v242_v17 = vmul.f32 %v918_v1, %v918_v1  ;;  %v246_v21 = vmul.f32 %v916_v0, %v916_v0  ;;  %692 = vmatpush3.bf16.msra.mxu0 %v755_v33  ;;  %s570_s6 = sshll.u32 %s1045_s29, 4  ;;  %s1090_s9 = scalar_lea.hbm %s1144_s4, %s680_s5  ;;  %s1092_s6 = int_to_ptr.vmem [resolvable:$true] %s570_s6 }
  0x1a   : > { %v253_v18 = vsel %vm208_vm0, %v243_v16, 0.0  ;;  %v265_v22 = vsel %vm208_vm0, %v247_v20, 0.0  ;;  %v245_v24 = vmul.f32 %v932_v8, %v932_v8  ;;  %v244_v25 = vmul.f32 %v934_v9, %v934_v9  ;;  %710 = vmatpush3.bf16.msra.mxu1 %v755_v33  ;;  %693 = vmatprep.subr.bf16.mxu0 %v756_v34  ;;  %s774_s19 = scalar_lea.vmem %s1092_s6, 1024  ;;  %p781_p0 = scmp.lt.s32.totalorder %s1092_s6, %s779_s12 }
  0x1b   : > { %v250_v19 = vsel %vm208_vm0, %v242_v17, 0.0  ;;  %v262_v23 = vsel %vm208_vm0, %v246_v21, 0.0  ;;  %v249_v28 = vmul.f32 %v940_v12, %v940_v12  ;;  %v248_v29 = vmul.f32 %v942_v13, %v942_v13  ;;  %707 = vmatprep.subr.bf16.mxu1 %v756_v34  ;;  %p775_p11 = scmp.ne.s32.totalorder %s1092_s6, %s774_s19  ;;  %p782_p1 = scmp.lt.s32.totalorder %s780_s13, %s774_s19 }
  0x1c   : > { %225 = vadd.xlane.f32.xlu1 %v224_v6  ;;  %v259_v26 = vsel %vm208_vm0, %v245_v24, 0.0  ;;  %v256_v27 = vsel %vm208_vm0, %v244_v25, 0.0 }
  0x1d   : > { %213 = vadd.xlane.f32.xlu0 %v212_v7  ;;  %v271_v30 = vsel %vm208_vm0, %v249_v28, 0.0  ;;  %v268_v31 = vsel %vm208_vm0, %v248_v29, 0.0  ;;  %694 = vmatpush3.bf16.msra.mxu0 %v756_v34  ;;  %p776_p12 = pnand %p775_p11, %p902_p5  ;;  %p783_p2 = por %p782_p1, %p781_p0 }
  0x1e   : > { %711 = vmatpush3.bf16.msra.mxu1 %v756_v34  ;;  %695 = vmatprep.subr.bf16.mxu0 %v757_v35 }
  0x1f   : > { %708 = vmatprep.subr.bf16.mxu1 %v757_v35  ;;  %p777_p13 = pneg %p776_p12 }
  0x20   : > { %219 = vadd.xlane.f32.xlu1 %v218_v10 }
  0x21   : > { %216 = vadd.xlane.f32.xlu0 %v215_v11  ;;  %696 = vmatpush3.bf16.msra.mxu0 %v757_v35  ;;  %p784_p3 = pnand %p783_p2, %p777_p13 }
  0x22   : > { %712 = vmatpush3.bf16.msra.mxu1 %v757_v35 }
  0x24   : > { %231 = vadd.xlane.f32.xlu1 %v230_v14 }
  0x25   : > { %228 = vadd.xlane.f32.xlu0 %v227_v15 }
  0x28   : > { %254 = vadd.xlane.f32.xlu1 %v253_v18 }
  0x29   : > { %251 = vadd.xlane.f32.xlu0 %v250_v19 }
  0x2c   : > { %266 = vadd.xlane.f32.xlu1 %v265_v22 }
  0x2d   : > { %263 = vadd.xlane.f32.xlu0 %v262_v23 }
  0x30   : > { %260 = vadd.xlane.f32.xlu1 %v259_v26 }
  0x31   : > { %257 = vadd.xlane.f32.xlu0 %v256_v27 }
  0x34   : > { %272 = vadd.xlane.f32.xlu1 %v271_v30 }
  0x35   : > { %269 = vadd.xlane.f32.xlu0 %v268_v31 }
  0xa1   : > { %v223_v36 = vpop.xlane.xlu1 %222 }
  0xa2   : > { %v211_v37 = vpop.xlane.xlu0 %210  ;;  %v988_v46 = vmul.f32 0.015625, %v223_v36 }
  0xa3   : > { %v984_v44 = vmul.f32 0.015625, %v211_v37 }
  0xa4   : > { %v286_v56 = vmul.f32 %v988_v46, %v988_v46 }
  0xa5   : > { %v226_v38 = vpop.xlane.xlu1 %225  ;;  %v282_v50 = vmul.f32 %v984_v44, %v984_v44 }
  0xa6   : > { %v214_v39 = vpop.xlane.xlu0 %213  ;;  %v990_v47 = vmul.f32 0.015625, %v226_v38 }
  0xa7   : > { %v986_v45 = vmul.f32 0.015625, %v214_v39 }
  0xa8   : > { %v287_v57 = vmul.f32 %v990_v47, %v990_v47 }
  0xa9   : > { %v220_v40 = vpop.xlane.xlu1 %219  ;;  %v283_v51 = vmul.f32 %v986_v45, %v986_v45 }
  0xaa   : > { %v217_v41 = vpop.xlane.xlu0 %216  ;;  %v1000_v58 = vmul.f32 0.015625, %v220_v40 }
  0xab   : > { %v1002_v4 = vmul.f32 0.015625, %v217_v41 }
  0xac   : > { %v285_v14 = vmul.f32 %v1000_v58, %v1000_v58 }
  0xad   : > { %v232_v42 = vpop.xlane.xlu1 %231  ;;  %v284_v22 = vmul.f32 %v1002_v4, %v1002_v4 }
  0xae   : > { %v229_v43 = vpop.xlane.xlu0 %228  ;;  %v1006_v15 = vmul.f32 0.015625, %v232_v42 }
  0xaf   : > { %v1008_v16 = vmul.f32 0.015625, %v229_v43 }
  0xb0   : > { %v289_v27 = vmul.f32 %v1006_v15, %v1006_v15 }
  0xb1   : > { %v255_v48 = vpop.xlane.xlu1 %254  ;;  %v288_v28 = vmul.f32 %v1008_v16, %v1008_v16 }
  0xb2   : > { %v252_v49 = vpop.xlane.xlu0 %251  ;;  %v275_v52 = vmul.f32 0.015625, %v255_v48  ;;  %v323_v48 = vsub.f32 %v926_v5, %v986_v45  ;;  %v327_v5 = vsub.f32 %v920_v2, %v990_v47 }
  0xb3   : > { %v274_v53 = vmul.f32 0.015625, %v252_v49 }
  0xb4   : > { %v291_v54 = vsub.f32 %v275_v52, %v283_v51  ;;  %v639_v51 = vld [vmem:[%s1141_s1] ss:$0 sm:$0xff] }
  0xb5   : > { %v290_v55 = vsub.f32 %v274_v53, %v282_v50  ;;  %v267_v59 = vpop.xlane.xlu1 %266  ;;  %v322_v50 = vsub.f32 %v918_v1, %v984_v44  ;;  %v326_v1 = vsub.f32 %v916_v0, %v988_v46 }
  0xb6   : > { %v264_v60 = vpop.xlane.xlu0 %263  ;;  %v299_v61 = vmax.f32 %v291_v54, 0.0  ;;  %v279_v63 = vmul.f32 0.015625, %v267_v59 }
  0xb7   : > { %v298_v62 = vmax.f32 %v290_v55, 0.0  ;;  %v278_v3 = vmul.f32 0.015625, %v264_v60  ;;  %v640_v55 = vld [vmem:[%s1142_s2] ss:$0 sm:$0xff] }
  0xb8   : > { %v307_v6 = vadd.f32 1e-05, %v299_v61  ;;  %v295_v10 = vsub.f32 %v279_v63, %v287_v57  ;;  %v325_v63 = vsub.f32 %v932_v8, %v1000_v58  ;;  %v328_v8 = vsub.f32 %v942_v13, %v1008_v16 }
  0xb9   : > { %v306_v7 = vadd.f32 1e-05, %v298_v62  ;;  %v294_v11 = vsub.f32 %v278_v3, %v286_v56  ;;  %v261_v17 = vpop.xlane.xlu1 %260 }
  0xba   : > { %v258_v18 = vpop.xlane.xlu0 %257  ;;  %758 = vrsqrt.f32 %v307_v6  ;;  %v303_v19 = vmax.f32 %v295_v10, 0.0  ;;  %v277_v21 = vmul.f32 0.015625, %v261_v17  ;;  %v329_v17 = vsub.f32 %v940_v12, %v1006_v15 }
  0xbb   : > { %v302_v20 = vmax.f32 %v294_v11, 0.0  ;;  %760 = vrsqrt.f32 %v306_v7  ;;  %v276_v23 = vmul.f32 0.015625, %v258_v18  ;;  %v324_v7 = vsub.f32 %v934_v9, %v1002_v4 }
  0xbc   : > { %v311_v24 = vadd.f32 1e-05, %v303_v19  ;;  %v293_v26 = vsub.f32 %v277_v21, %v285_v14 }
  0xbd   : > { %v310_v25 = vadd.f32 1e-05, %v302_v20  ;;  %v292_v29 = vsub.f32 %v276_v23, %v284_v22  ;;  %v273_v30 = vpop.xlane.xlu1 %272 }
  0xbe   : > { %v270_v31 = vpop.xlane.xlu0 %269  ;;  %762 = vrsqrt.f32 %v311_v24  ;;  %v301_v32 = vmax.f32 %v293_v26, 0.0  ;;  %v281_v33 = vmul.f32 0.015625, %v273_v30 }
  0xbf   : > { %v280_v34 = vmul.f32 0.015625, %v270_v31  ;;  %764 = vrsqrt.f32 %v310_v25  ;;  %v300_v35 = vmax.f32 %v292_v29, 0.0 }
  0xc0   : > { %v309_v36 = vadd.f32 1e-05, %v301_v32  ;;  %v297_v37 = vsub.f32 %v281_v33, %v289_v27 }
  0xc1   : > { %v296_v38 = vsub.f32 %v280_v34, %v288_v28  ;;  %v308_v39 = vadd.f32 1e-05, %v300_v35 }
  0xc2   : > { %766 = vrsqrt.f32 %v309_v36  ;;  %v305_v40 = vmax.f32 %v297_v37, 0.0 }
  0xc3   : > { %v304_v41 = vmax.f32 %v296_v38, 0.0  ;;  %768 = vrsqrt.f32 %v308_v39 }
  0xc4   : > { %v313_v42 = vadd.f32 1e-05, %v305_v40 }
  0xc5   : > { %v312_v43 = vadd.f32 1e-05, %v304_v41 }
  0xc6   : > { %770 = vrsqrt.f32 %v313_v42 }
  0xc7   : > { %v759_v49 = vpop.eup %758  ;;  %772 = vrsqrt.f32 %v312_v43 }
  0xc8   : > { %v761_v52 = vpop.eup %760  ;;  %v331_v53 = vmul.f32 %v759_v49, %v323_v48 }
  0xc9   : > { %v330_v54 = vmul.f32 %v761_v52, %v322_v50 }
  0xca   : > { %v346_v45 = vmul.f32 %v639_v51, %v331_v53 }
  0xcb   : > { %v763_v56 = vpop.eup %762  ;;  %v345_v44 = vmul.f32 %v639_v51, %v330_v54 }
  0xcc   : > { %v765_v57 = vpop.eup %764  ;;  %v361_v59 = vadd.f32 %v640_v55, %v346_v45  ;;  %v335_v60 = vmul.f32 %v763_v56, %v327_v5 }
  0xcd   : > { %v360_v61 = vadd.f32 %v640_v55, %v345_v44  ;;  %v334_v62 = vmul.f32 %v765_v57, %v326_v1 }
  0xce   : > { %v350_v3 = vmul.f32 %v639_v51, %v335_v60 }
  0xcf   : > { %v767_v6 = vpop.eup %766  ;;  %v368_v2 = vpack.c.bf16 %v361_v59, %v360_v61  ;;  %v349_v47 = vmul.f32 %v639_v51, %v334_v62 }
  0xd0   : > { %v769_v10 = vpop.eup %768  ;;  %v365_v11 = vadd.f32 %v640_v55, %v350_v3  ;;  %v333_v14 = vmul.f32 %v767_v6, %v325_v63 }
  0xd1   : > { %697 = vmatprep.mubr.msk.bf16.mxu0 %vm208_vm0, %v368_v2  ;;  %v364_v0 = vadd.f32 %v640_v55, %v349_v47  ;;  %v332_v46 = vmul.f32 %v769_v10, %v324_v7 }
  0xd2   : > { %v348_v18 = vmul.f32 %v639_v51, %v333_v14 }
  0xd3   : > { %v771_v19 = vpop.eup %770  ;;  %v370_v58 = vpack.c.bf16 %v365_v11, %v364_v0  ;;  %v347_v9 = vmul.f32 %v639_v51, %v332_v46 }
  0xd4   : > { %v773_v4 = vpop.eup %772  ;;  %v363_v20 = vadd.f32 %v640_v55, %v348_v18  ;;  %v337_v21 = vmul.f32 %v771_v19, %v329_v17 }
  0xd5   : > { %701 = vmatprep.mubr.msk.bf16.mxu1 %vm208_vm0, %v370_v58  ;;  %v362_v22 = vadd.f32 %v640_v55, %v347_v9  ;;  %v336_v23 = vmul.f32 %v773_v4, %v328_v8 }
  0xd6   : > { %v352_v24 = vmul.f32 %v639_v51, %v337_v21 }
  0xd7   : > { %v369_v25 = vpack.c.bf16 %v363_v20, %v362_v22  ;;  %v351_v26 = vmul.f32 %v639_v51, %v336_v23 }
  0xd8   : > { %v367_v12 = vadd.f32 %v640_v55, %v352_v24 }
  0xd9   : > { %698 = vmatmul.mubr.msk.bf16.vlgmr.msra.gmra.mxu0 %vm208_vm0, %v369_v25  ;;  %v366_v15 = vadd.f32 %v640_v55, %v351_v26 }
  0xdb   : > { %v371_v27 = vpack.c.bf16 %v367_v12, %v366_v15 }
  0xdd   : > { %702 = vmatmul.mubr.msk.bf16.vlgmr.msra.gmra.mxu1 %vm208_vm0, %v371_v27 }
 0x199   : > { %v699_v13 = vpop.f32.mrf.mxu0 }
 0x19a   : > { %v673_v16 = vpack.c.bf16 %v699_v13, %v699_v13 }
 0x19b   : > { %v450_v28 = vpop.f32.mrf.mxu0 }
 0x19c   : > { %516 = vst.msk [vmem:[%s1045_s29 + $0x10] sm:$0xf] %vm513_vm1, %v673_v16  ;;  %v671_v29 = vpack.c.bf16 %v450_v28, %v450_v28  ;;  %526 = vrot.lane.b32.xlu1 %v673_v16, %s836_s30 }
 0x19d   : > { %v700_v30 = vpop.f32.mrf.mxu0  ;;  %v703_v31 = vpop.f32.mrf.mxu1 }
 0x19e   : > { %514 = vst.msk [vmem:[%s1045_s29] sm:$0xf] %vm513_vm1, %v671_v29  ;;  %v674_v32 = vpack.c.bf16 %v700_v30, %v700_v30  ;;  %v677_v33 = vpack.c.bf16 %v703_v31, %v703_v31  ;;  %522 = vrot.lane.b32.xlu0 %v671_v29, %s836_s30 }
 0x19f   : > { %v453_v34 = vpop.f32.mrf.mxu0  ;;  %v466_v35 = vpop.f32.mrf.mxu1 }
 0x1a0   : > { %517 = vst.msk [vmem:[%s1045_s29 + $0x18] sm:$0xf] %vm513_vm1, %v674_v32  ;;  %520 = vst.msk [vmem:[%s1045_s29 + $0x30] sm:$0xf] %vm513_vm1, %v677_v33  ;;  %v672_v36 = vpack.c.bf16 %v453_v34, %v453_v34  ;;  %v675_v37 = vpack.c.bf16 %v466_v35, %v466_v35  ;;  %528 = vrot.lane.b32.xlu1 %v674_v32, %s836_s30 }
 0x1a1   : > { %v704_v38 = vpop.f32.mrf.mxu1 }
 0x1a2   : > { %515 = vst.msk [vmem:[%s1045_s29 + $0x8] sm:$0xf] %vm513_vm1, %v672_v36  ;;  %518 = vst.msk [vmem:[%s1045_s29 + $0x20] sm:$0xf] %vm513_vm1, %v675_v37  ;;  %v678_v39 = vpack.c.bf16 %v704_v38, %v704_v38  ;;  %530 = vrot.lane.b32.xlu0 %v675_v37, %s836_s30 }
 0x1a3   : > { %v469_v40 = vpop.f32.mrf.mxu1 }
 0x1a4   : > { %521 = vst.msk [vmem:[%s1045_s29 + $0x38] sm:$0xf] %vm513_vm1, %v678_v39  ;;  %v676_v41 = vpack.c.bf16 %v469_v40, %v469_v40  ;;  %524 = vrot.lane.b32.xlu1 %v672_v36, %s836_s30 }
 0x1a6   : > { %519 = vst.msk [vmem:[%s1045_s29 + $0x28] sm:$0xf] %vm513_vm1, %v676_v41  ;;  %534 = vrot.lane.b32.xlu0 %v677_v33, %s836_s30 }
 0x1a8   : > { %532 = vrot.lane.b32.xlu1 %v676_v41, %s836_s30 }
 0x1ac   : > { %536 = vrot.lane.b32.xlu1 %v678_v39, %s836_s30 }
 0x20e   : > { %v527_v42 = vpop.permute.xlu1 %526 }
 0x20f   : > { %659 = vst.msk [vmem:[%s1045_s29 + $0x14] sm:$0xf] %vm513_vm1, %v527_v42 }
 0x210   : > { %v523_v43 = vpop.permute.xlu0 %522 }
 0x211   : > { %657 = vst.msk [vmem:[%s1045_s29 + $0x4] sm:$0xf] %vm513_vm1, %v523_v43 }
 0x212   : > { %v529_v48 = vpop.permute.xlu1 %528 }
 0x213   : > { %660 = vst.msk [vmem:[%s1045_s29 + $0x1c] sm:$0xf] %vm513_vm1, %v529_v48 }
 0x214   : > { %v531_v49 = vpop.permute.xlu0 %530 }
 0x215   : > { %661 = vst.msk [vmem:[%s1045_s29 + $0x24] sm:$0xf] %vm513_vm1, %v531_v49 }
 0x216   : > { %v525_v50 = vpop.permute.xlu1 %524 }
 0x217   : > { %658 = vst.msk [vmem:[%s1045_s29 + $0xc] sm:$0xf] %vm513_vm1, %v525_v50 }
 0x218   : > { %v535_v51 = vpop.permute.xlu0 %534 }
 0x219   : > { %663 = vst.msk [vmem:[%s1045_s29 + $0x34] sm:$0xf] %vm513_vm1, %v535_v51 }
 0x21a   : > { %v533_v52 = vpop.permute.xlu1 %532 }
 0x21b   : > { %662 = vst.msk [vmem:[%s1045_s29 + $0x2c] sm:$0xf] %vm513_vm1, %v533_v52 }
 0x21e   : > { %v537_v53 = vpop.permute.xlu1 %536 }
 0x21f   : > { %664 = vst.msk [vmem:[%s1045_s29 + $0x3c] sm:$0xf] %vm513_vm1, %v537_v53 }
 0x220   : > { %787 = shalt.err (!%p784_p3)
}
 0x221   : > { %s788_s14 = scalar_lea.hbm %s1090_s9, 1024  ;;  %s792_s23 = scalar_lea.hbm %s1144_s4, 2048 }
 0x222   : > { %p789_p4 = scmp.ne.s32.totalorder %s1090_s9, %s788_s14  ;;  %p793_p9 = scmp.lt.s32.totalorder %s1090_s9, %s1144_s4 }
 0x223   : > { %p794_p10 = scmp.lt.s32.totalorder %s792_s23, %s788_s14 }
 0x224   : > { %p790_p7 = pnand %p789_p4, %p902_p5 }
 0x225   : > { %p795_p11 = por %p794_p10, %p793_p9 }
 0x226   : > { %p791_p8 = pneg %p790_p7 }
 0x228   : > { %p796_p12 = pnand %p795_p11, %p791_p8 }
 0x22a   : > { %799 = shalt.err (!%p796_p12)
}
 0x22b   : > { %s838_s29 = smov 4  }
 0x22c   : > { %713 = dma.vmem_to_hbm [thread:$0]  (%p902_p5), %s1092_s6, 1024, %s1090_s9, %s1098_s10, %s836_s30, %s836_s30, %s838_s29  }
 0x22d PF: > { %p719_p13 = scmp.ge.s32.totalorder %s834_s18, 2  ;;  %s585_s5 = sand.u32 1, %s822_s15  }
 0x22e   : > { %s586_s7 = scalar_lea.sflag [#allocation3], %s585_s5 }
 0x22f   : > { %p716_p0 = pnand %p719_p13, %p906_p6 }
 0x231   : > { %p717_p1 = pneg %p716_p0 }
 0x233   : > { %817 = dma.done.wait (%p717_p1), %s586_s7, 1024  }
 0x234   : > { %819 = vsyncadd (%p717_p1), %s586_s7, 4294966272  ;;  %p14_p2 = scmp.ge.s32.totalorder %s889_s21, 4   ;;  %s1147_s15 = smov %s826_s16 }
 0x235   : > { %s1148_s16 = smov %s830_s17  ;;  %s1149_s17 = smov %s900_s24 }
 0x236   : > { %s1150_s18 = smov %s889_s21  ;;  %16 = sbr.rel (!%p14_p2) target bundleno = 3 (0x3), region = 72 }
 0x23b   :  { %591 = vsyncpa [#allocation3], 1 }
 0x23c   :  { %593 = vsyncpa [#allocation3 + $0x1], 1 }

</bundles_post_ra>
